<compile_context>
chip_gen: v6e
topology: v6e:2x2x1
jax: 0.10.0
libtpu: 0.0.40
codegen_flags: <defaults>
</compile_context>

<pallas_src>
import functools
import math

import jax
import jax.numpy as jnp
from jax.experimental import pallas as pl
from jax.experimental.pallas import tpu as pltpu


def _make_coord_norm_kernel(norm: str, zero_com: bool, eps: float, n_coord_sets: int):
    sqrt_sets = math.sqrt(n_coord_sets)

    def kernel(w_ref, c_ref, m3_ref, o_ref):
        # Block shapes: w_ref (TR, 1) f32, c_ref/m3_ref/o_ref (TR, L) with
        # L = 3*N. Each row is one (batch, coord-set) slab; lane j of a row
        # holds component (j % 3) of node (j // 3)  -- i.e. the native
        # [..., N, 3] memory order, kept lane-dense.
        c = c_ref[...].astype(jnp.float32)     # (TR, L) coords
        m3 = m3_ref[...].astype(jnp.float32)   # (TR, L) node mask repeated x3
        w = w_ref[...]                         # (TR, 1) per-row set weight

        # component id per lane: 0,1,2,0,1,2,...
        comp = jax.lax.broadcasted_iota(jnp.int32, c.shape, 1) % 3

        cm = c * m3
        # number of real nodes per row (each node counted 3x in this layout)
        n_atoms = jnp.sum(m3, axis=-1, keepdims=True) / 3.0          # (TR, 1)
        # Guard fully-padded rows (PyTorch would produce NaN there; for any
        # row with >=1 real node this is a no-op).
        inv_n = 1.0 / jnp.maximum(n_atoms, 1.0)

        if zero_com:
            # Per-component masked sums over nodes (lane reductions), then
            # broadcast the right component's COM back to every lane.
            sx = jnp.sum(jnp.where(comp == 0, cm, 0.0), axis=-1, keepdims=True)
            sy = jnp.sum(jnp.where(comp == 1, cm, 0.0), axis=-1, keepdims=True)
            sz = jnp.sum(jnp.where(comp == 2, cm, 0.0), axis=-1, keepdims=True)
            com = jnp.where(comp == 0, sx, jnp.where(comp == 1, sy, sz)) * inv_n
            cen = (c - com) * m3               # centred + masked coords
        else:
            cen = cm

        if norm == "none":
            out = cen * w
        else:
            sq = cen * cen
            # win[j] = sq[j-1] + sq[j] + sq[j+1]; at lanes j = 3n+1 this equals
            # ||cen_n||^2 (no wraparound contamination at those lanes, and the
            # expression is symmetric in the roll direction).
            win = sq + jnp.roll(sq, 1, axis=-1) + jnp.roll(sq, -1, axis=-1)
            len1 = jnp.where(comp == 1, jnp.sqrt(win), 0.0)  # per-node length at lane 3n+1
            if norm == "length":
                mean_len = jnp.sum(len1, axis=-1, keepdims=True) * inv_n  # (TR, 1)
                scale = w / (mean_len + eps)                              # (TR, 1)
                out = cen * scale
            else:  # 'gvp'
                # broadcast each node's length to its 3 lanes
                lens = len1 + jnp.roll(len1, 1, axis=-1) + jnp.roll(len1, -1, axis=-1)
                out = cen * ((w * sqrt_sets) / (lens + eps))

        o_ref[...] = out.astype(o_ref.dtype)

    return kernel


def _pick_rows_per_block(n_rows: int, lane_width: int) -> int:
    """Rows of B*S per grid step: big blocks, but <= ~16 MiB double-buffered."""
    # coords f32 + out f32 + mask bf16, each double-buffered (+ tiny weight col)
    bytes_per_row = lane_width * (4 + 4 + 2) * 2 + 16
    budget = max(16, (16 * 1024 * 1024) // bytes_per_row)
    tr = min(n_rows, 1024, budget)
    if tr < n_rows:
        # keep the sublane tiling happy for both f32 (8) and bf16 (16) blocks
        tr = max(16, (tr // 16) * 16)
    return tr


@functools.partial(jax.jit, static_argnames=("norm", "zero_com", "eps"))
def coord_norm_pallas(coord_sets, node_mask, set_weights,
                      norm="length", zero_com=True, eps=1e-6):
    """Pallas implementation of CoordNorm.forward.

    Args:
        coord_sets: [B, S, N, 3]
        node_mask:  [B, S, N] (1 for real nodes, 0 otherwise)
        set_weights: [1, S, 1, 1] learnable weights
    Returns:
        [B, S, N, 3], same dtype as coord_sets.
    """
    B, S, N, D = coord_sets.shape
    assert D == 3
    R, L = B * S, 3 * N

    # Free views: no data movement, coords stay in native memory order.
    coords_flat = coord_sets.reshape(R, L)
    # Mask expanded once to the interleaved 3N layout, in bf16 to keep the
    # extra HBM traffic small relative to the coords themselves.
    mask3 = jnp.repeat(node_mask.reshape(R, N).astype(jnp.bfloat16), 3, axis=-1)
    # Per-row (b, s) weight column; folded into the scale inside the kernel.
    w_rows = jnp.broadcast_to(set_weights.reshape(1, S), (B, S)).reshape(R, 1)
    w_rows = w_rows.astype(jnp.float32)

    tr = _pick_rows_per_block(R, L)
    kernel = _make_coord_norm_kernel(norm, zero_com, float(eps), S)

    out_flat = pl.pallas_call(
        kernel,
        out_shape=jax.ShapeDtypeStruct((R, L), coord_sets.dtype),
        grid=(pl.cdiv(R, tr),),
        in_specs=[
            pl.BlockSpec((tr, 1), lambda i: (i, 0)),   # per-row weights
            pl.BlockSpec((tr, L), lambda i: (i, 0)),   # coords (lane-dense)
            pl.BlockSpec((tr, L), lambda i: (i, 0)),   # expanded mask (bf16)
        ],
        out_specs=pl.BlockSpec((tr, L), lambda i: (i, 0)),
        compiler_params=pltpu.CompilerParams(
            dimension_semantics=("parallel",)),
    )(w_rows, coords_flat, mask3)

    return out_flat.reshape(B, S, N, 3)


def coord_norm_reference(coord_sets, node_mask, set_weights,
                         norm="length", zero_com=True, eps=1e-6):
    """Pure-JAX reference mirroring the PyTorch forward (for validation)."""
    mask = node_mask.astype(coord_sets.dtype)
    n_atoms = mask.sum(axis=-1, keepdims=True)  # [B,S,1]
    if zero_com:
        masked = coord_sets * mask[..., None]
        com = masked.sum(axis=2, keepdims=True) / n_atoms[..., None]
        coord_sets = coord_sets - com
    coord_sets = coord_sets * mask[..., None]
    lengths = jnp.linalg.norm(coord_sets, axis=-1)  # [B,S,N]
    if norm == "length":
        scaled_lengths = lengths.sum(axis=2, keepdims=True) / n_atoms
        coord_div = scaled_lengths[..., None] + eps
    elif norm == "gvp":
        coord_div = (lengths[..., None] + eps) / math.sqrt(coord_sets.shape[1])
    else:
        coord_div = jnp.ones_like(coord_sets)
    out = coord_sets * set_weights / coord_div
    return out * mask[..., None]


if __name__ == "__main__":
    B, S, N = 2, 4, 8  # batch, n_coord_sets, n_nodes

    key = jax.random.PRNGKey(0)
    k_coords, _ = jax.random.split(key)

    coord_sets = jax.random.normal(k_coords, (B, S, N, 3), dtype=jnp.float32) * 2.0

    # Deterministic node mask: first few nodes real, rest padded (>=1 real per set).
    node_counts = jnp.array([[6, 8, 5, 7], [8, 4, 8, 6]], dtype=jnp.int32)  # [B,S]
    node_idx = jnp.arange(N)[None, None, :]
    node_mask = (node_idx < node_counts[..., None]).astype(jnp.float32)  # [B,S,N]

    # Module initialises weights to ones; perturb deterministically so the
    # per-set weight path is actually exercised.
    set_weights = (jnp.ones((1, S, 1, 1), dtype=jnp.float32)
                   + 0.1 * jnp.arange(S, dtype=jnp.float32).reshape(1, S, 1, 1))

    configs = [("length", True), ("gvp", True), ("none", False), ("length", False)]
    for norm, zero_com in configs:
        out = coord_norm_pallas(coord_sets, node_mask, set_weights,
                                norm=norm, zero_com=zero_com, eps=1e-6)
        out = jax.block_until_ready(out)
        ref = coord_norm_reference(coord_sets, node_mask, set_weights,
                                   norm=norm, zero_com=zero_com, eps=1e-6)
        assert out.shape == (B, S, N, 3)
        assert jnp.allclose(out, ref, atol=1e-5, rtol=1e-4), \
            f"mismatch vs reference (norm={norm}, zero_com={zero_com})"

    print("KERNEL_OK")
</pallas_src>

<mosaic_0001>
module attributes {stable_mosaic.version = 11 : i64} {
  func.func @kernel(%arg0: i32, %arg1: memref<8x1xf32, #tpu.memory_space<vmem>>, %arg2: memref<8x24xf32, #tpu.memory_space<vmem>>, %arg3: memref<8x24xbf16, #tpu.memory_space<vmem>>, %arg4: memref<8x24xf32, #tpu.memory_space<vmem>>) attributes {dimension_semantics = [#tpu.dimension_semantics<parallel>], iteration_bounds = array<i64: 1>, scalar_prefetch = 0 : i64, scratch_operands = 0 : i64, tpu.core_type = #tpu.core_type<tc>, window_params = [{transform_indices = @transform_0, window_bounds = array<i64: 8, 1>}, {transform_indices = @transform_1, window_bounds = array<i64: 8, 24>}, {transform_indices = @transform_2, window_bounds = array<i64: 8, 24>}, {transform_indices = @transform_3, window_bounds = array<i64: 8, 24>}]} {
    %c0 = arith.constant 0 : index
    %c0_0 = arith.constant 0 : index
    %0 = vector.load %arg2[%c0, %c0_0] : memref<8x24xf32, #tpu.memory_space<vmem>>, vector<8x24xf32>
    %c0_1 = arith.constant 0 : index
    %c0_2 = arith.constant 0 : index
    %1 = vector.load %arg3[%c0_1, %c0_2] : memref<8x24xbf16, #tpu.memory_space<vmem>>, vector<8x24xbf16>
    %2 = arith.extf %1 : vector<8x24xbf16> to vector<8x24xf32>
    %c0_3 = arith.constant 0 : index
    %c0_4 = arith.constant 0 : index
    %3 = vector.load %arg1[%c0_3, %c0_4] : memref<8x1xf32, #tpu.memory_space<vmem>>, vector<8x1xf32>
    %4 = tpu.iota {dimensions = array<i32: 1>} : vector<8x24xi32>
    %c3_i32 = arith.constant 3 : i32
    %c0_i32 = arith.constant 0 : i32
    %5 = arith.cmpi eq, %c3_i32, %c0_i32 : i32
    %c1_i32 = arith.constant 1 : i32
    %6 = arith.select %5, %c1_i32, %c3_i32 : i32
    %7 = vector.broadcast %6 : i32 to vector<8x24xi32>
    %8 = arith.remsi %4, %7 : vector<8x24xi32>
    %c0_i32_5 = arith.constant 0 : i32
    %9 = vector.broadcast %c0_i32_5 : i32 to vector<8x24xi32>
    %10 = arith.cmpi ne, %8, %9 : vector<8x24xi32>
    %c0_i32_6 = arith.constant 0 : i32
    %11 = vector.broadcast %c0_i32_6 : i32 to vector<8x24xi32>
    %12 = arith.cmpi slt, %8, %11 : vector<8x24xi32>
    %c0_i32_7 = arith.constant 0 : i32
    %13 = arith.cmpi slt, %6, %c0_i32_7 : i32
    %14 = vector.broadcast %13 : i1 to vector<8x24xi1>
    %15 = vector.broadcast %14 : vector<8x24xi1> to vector<8x24xi1>
    %16 = arith.xori %12, %15 : vector<8x24xi1>
    %17 = arith.andi %16, %10 : vector<8x24xi1>
    %18 = vector.broadcast %6 : i32 to vector<8x24xi32>
    %19 = arith.addi %8, %18 : vector<8x24xi32>
    %20 = arith.select %17, %19, %8 : vector<8x24xi1>, vector<8x24xi32>
    %21 = arith.mulf %0, %2 : vector<8x24xf32>
    %cst = arith.constant dense<0.000000e+00> : vector<8xf32>
    %22 = vector.multi_reduction <add>, %2, %cst [1] : vector<8x24xf32> to vector<8xf32>
    %23 = vector.shape_cast %22 : vector<8xf32> to vector<8x1xf32>
    %cst_8 = arith.constant 3.000000e+00 : f32
    %24 = vector.broadcast %cst_8 : f32 to vector<8x1xf32>
    %25 = arith.divf %23, %24 : vector<8x1xf32>
    %cst_9 = arith.constant 1.000000e+00 : f32
    %26 = vector.broadcast %cst_9 : f32 to vector<8x1xf32>
    %27 = arith.maximumf %25, %26 : vector<8x1xf32>
    %cst_10 = arith.constant 1.000000e+00 : f32
    %28 = vector.broadcast %cst_10 : f32 to vector<8x1xf32>
    %29 = arith.divf %28, %27 : vector<8x1xf32>
    %c0_i32_11 = arith.constant 0 : i32
    %30 = vector.broadcast %c0_i32_11 : i32 to vector<8x24xi32>
    %31 = arith.cmpi eq, %20, %30 : vector<8x24xi32>
    %cst_12 = arith.constant 0.000000e+00 : f32
    %32 = vector.broadcast %cst_12 : f32 to vector<8x24xf32>
    %33 = arith.select %31, %21, %32 : vector<8x24xi1>, vector<8x24xf32>
    %cst_13 = arith.constant dense<0.000000e+00> : vector<8xf32>
    %34 = vector.multi_reduction <add>, %33, %cst_13 [1] : vector<8x24xf32> to vector<8xf32>
    %35 = vector.shape_cast %34 : vector<8xf32> to vector<8x1xf32>
    %c1_i32_14 = arith.constant 1 : i32
    %36 = vector.broadcast %c1_i32_14 : i32 to vector<8x24xi32>
    %37 = arith.cmpi eq, %20, %36 : vector<8x24xi32>
    %cst_15 = arith.constant 0.000000e+00 : f32
    %38 = vector.broadcast %cst_15 : f32 to vector<8x24xf32>
    %39 = arith.select %37, %21, %38 : vector<8x24xi1>, vector<8x24xf32>
    %cst_16 = arith.constant dense<0.000000e+00> : vector<8xf32>
    %40 = vector.multi_reduction <add>, %39, %cst_16 [1] : vector<8x24xf32> to vector<8xf32>
    %41 = vector.shape_cast %40 : vector<8xf32> to vector<8x1xf32>
    %c2_i32 = arith.constant 2 : i32
    %42 = vector.broadcast %c2_i32 : i32 to vector<8x24xi32>
    %43 = arith.cmpi eq, %20, %42 : vector<8x24xi32>
    %cst_17 = arith.constant 0.000000e+00 : f32
    %44 = vector.broadcast %cst_17 : f32 to vector<8x24xf32>
    %45 = arith.select %43, %21, %44 : vector<8x24xi1>, vector<8x24xf32>
    %cst_18 = arith.constant dense<0.000000e+00> : vector<8xf32>
    %46 = vector.multi_reduction <add>, %45, %cst_18 [1] : vector<8x24xf32> to vector<8xf32>
    %47 = vector.shape_cast %46 : vector<8xf32> to vector<8x1xf32>
    %c0_i32_19 = arith.constant 0 : i32
    %48 = vector.broadcast %c0_i32_19 : i32 to vector<8x24xi32>
    %49 = arith.cmpi eq, %20, %48 : vector<8x24xi32>
    %c1_i32_20 = arith.constant 1 : i32
    %50 = vector.broadcast %c1_i32_20 : i32 to vector<8x24xi32>
    %51 = arith.cmpi eq, %20, %50 : vector<8x24xi32>
    %52 = vector.shape_cast %41 : vector<8x1xf32> to vector<8x1xf32>
    %53 = vector.broadcast %52 : vector<8x1xf32> to vector<8x24xf32>
    %54 = vector.shape_cast %47 : vector<8x1xf32> to vector<8x1xf32>
    %55 = vector.broadcast %54 : vector<8x1xf32> to vector<8x24xf32>
    %56 = arith.select %51, %53, %55 : vector<8x24xi1>, vector<8x24xf32>
    %57 = vector.shape_cast %35 : vector<8x1xf32> to vector<8x1xf32>
    %58 = vector.broadcast %57 : vector<8x1xf32> to vector<8x24xf32>
    %59 = arith.select %49, %58, %56 : vector<8x24xi1>, vector<8x24xf32>
    %60 = vector.broadcast %29 : vector<8x1xf32> to vector<8x24xf32>
    %61 = arith.mulf %59, %60 : vector<8x24xf32>
    %62 = arith.subf %0, %61 : vector<8x24xf32>
    %63 = arith.mulf %62, %2 : vector<8x24xf32>
    %64 = arith.mulf %63, %63 : vector<8x24xf32>
    %65 = vector.extract_strided_slice %64 {offsets = [0, 23], sizes = [8, 1], strides = [1, 1]} : vector<8x24xf32> to vector<8x1xf32>
    %66 = vector.extract_strided_slice %64 {offsets = [0, 0], sizes = [8, 23], strides = [1, 1]} : vector<8x24xf32> to vector<8x23xf32>
    %67 = tpu.concatenate %65, %66 in 1 : vector<8x1xf32>, vector<8x23xf32> -> vector<8x24xf32>
    %68 = arith.addf %64, %67 : vector<8x24xf32>
    %69 = vector.extract_strided_slice %64 {offsets = [0, 1], sizes = [8, 23], strides = [1, 1]} : vector<8x24xf32> to vector<8x23xf32>
    %70 = vector.extract_strided_slice %64 {offsets = [0, 0], sizes = [8, 1], strides = [1, 1]} : vector<8x24xf32> to vector<8x1xf32>
    %71 = tpu.concatenate %69, %70 in 1 : vector<8x23xf32>, vector<8x1xf32> -> vector<8x24xf32>
    %72 = arith.addf %68, %71 : vector<8x24xf32>
    %c1_i32_21 = arith.constant 1 : i32
    %73 = vector.broadcast %c1_i32_21 : i32 to vector<8x24xi32>
    %74 = arith.cmpi eq, %20, %73 : vector<8x24xi32>
    %75 = math.sqrt %72 : vector<8x24xf32>
    %cst_22 = arith.constant 0.000000e+00 : f32
    %76 = vector.broadcast %cst_22 : f32 to vector<8x24xf32>
    %77 = arith.select %74, %75, %76 : vector<8x24xi1>, vector<8x24xf32>
    %cst_23 = arith.constant dense<0.000000e+00> : vector<8xf32>
    %78 = vector.multi_reduction <add>, %77, %cst_23 [1] : vector<8x24xf32> to vector<8xf32>
    %79 = vector.shape_cast %78 : vector<8xf32> to vector<8x1xf32>
    %80 = arith.mulf %79, %29 : vector<8x1xf32>
    %cst_24 = arith.constant 9.99999997E-7 : f32
    %81 = vector.broadcast %cst_24 : f32 to vector<8x1xf32>
    %82 = arith.addf %80, %81 : vector<8x1xf32>
    %83 = arith.divf %3, %82 : vector<8x1xf32>
    %84 = vector.broadcast %83 : vector<8x1xf32> to vector<8x24xf32>
    %85 = arith.mulf %63, %84 : vector<8x24xf32>
    %c0_25 = arith.constant 0 : index
    %c0_26 = arith.constant 0 : index
    %86 = vector.load %arg4[%c0_25, %c0_26] : memref<8x24xf32, #tpu.memory_space<vmem>>, vector<8x24xf32>
    tpu.vector_store %arg4[%c0_25, %c0_26], %85 {strides = array<i32>} : memref<8x24xf32, #tpu.memory_space<vmem>>, vector<8x24xf32>,
    return
  }
  func.func @transform_0(%arg0: i32) -> (i32, i32) {
    %c0_i32 = arith.constant 0 : i32
    %c0_i32_0 = arith.constant 0 : i32
    return %arg0, %c0_i32 : i32, i32
  }
  func.func @transform_1(%arg0: i32) -> (i32, i32) {
    %c0_i32 = arith.constant 0 : i32
    %c0_i32_0 = arith.constant 0 : i32
    return %arg0, %c0_i32 : i32, i32
  }
  func.func @transform_2(%arg0: i32) -> (i32, i32) {
    %c0_i32 = arith.constant 0 : i32
    %c0_i32_0 = arith.constant 0 : i32
    return %arg0, %c0_i32 : i32, i32
  }
  func.func @transform_3(%arg0: i32) -> (i32, i32) {
    %c0_i32 = arith.constant 0 : i32
    %c0_i32_0 = arith.constant 0 : i32
    return %arg0, %c0_i32 : i32, i32
  }
}

</mosaic_0001>

<bundles_post_ra>
// kernel: coord_norm_pallas.1
= control target key start
LH: loop header
LB: loop body
LE: loop exit
PB: predicated region body
PF: predicated region fallthrough
CT: control target
= control target key end

     0   :  { %v18_v0 = vlaneseq  ;;  %vm37_vm0 = vcmask 195584   ;;  %s129_s16 = smov 127   ;;  %s130_s17 = smov 23   ;;  %vm74_vm7 = vcmask 7168   ;;  %vm83_vm8 = vcmask 187392   ;;  %s179_s2 = inlined_call_operand.vmem [shape: bf16[8,24], index: 2, kind: input, shape index: {}]   ;;  %s180_s1 = inlined_call_operand.vmem [shape: f32[8,24], index: 1, kind: input, shape index: {}]   ;;  %s181_s0 = inlined_call_operand.vmem [shape: f32[8,1], index: 0, kind: input, shape index: {}]   ;;  %s182_s3 = inlined_call_operand.vmem [shape: f32[8,24], index: 3, kind: output, shape index: {}]  }
   0x1   :  { %v15_v1 = vld [vmem:[%s179_s2] sm:$0xf]  ;;  %s128_s2 = smov 105   ;;  %v131_v48 = vmov 0  }
   0x2   :  { %v16_v2 = vunpack.c.l.bf16 %v15_v1  ;;  %v19_v3 = vand.u32 127, %v18_v0  ;;  %v14_v9 = vld [vmem:[%s180_s1] sm:$0xff]  ;;  %s127_s1 = smov 1   ;;  %119 = vset.pattern.permute.xlu1 %v131_v48  ;;  %120 = vset.pattern.permute.xlu0 %v131_v48 }
   0x3   :  { %v17_v52 = vld [vmem:[%s181_s0] sm:$0xff] }
   0x4   :  { %v38_v4 = vsel %vm37_vm0, %v16_v2, 0.0  ;;  %v156_v5 = vmul.u32.u64.low 2863311531, %v19_v3  ;;  %v157_v6 = vmul.u32.u64.high 2863311531, %v19_v3, %v156_v5  ;;  %v36_v12 = vmul.f32 %v16_v2, %v14_v9 }
   0x5   :  { %39 = vadd.xlane.f32.xlu0 %v38_v4 }
   0x6   :  { %v26_v7 = vshrl.u32 %v157_v6, 1 }
   0x8   :  { %v27_v8 = vmul.u32 3, %v26_v7 }
   0xa   :  { %v28_v10 = vsub.s32 %v19_v3, %v27_v8 }
   0xc   :  { %vm31_vm1 = vcmp.ne.s32.totalorder %v28_v10, 0  ;;  %vm32_vm2 = vcmp.lt.s32.totalorder %v28_v10, 0  ;;  %v34_v11 = vadd.s32 3, %v28_v10 }
   0xd   :  { %vm33_vm3 = vmand %vm32_vm2, %vm31_vm1 }
   0xe   :  { %v35_v13 = vsel %vm33_vm3, %v34_v11, %v28_v10 }
   0xf   :  { %vm56_vm4 = vcmp.eq.s32.totalorder %v35_v13, 2  ;;  %vm51_vm5 = vcmp.eq.s32.totalorder %v35_v13, 1  ;;  %vm46_vm6 = vcmp.eq.s32.totalorder %v35_v13, 0 }
  0x10   :  { %v57_v14 = vsel %vm56_vm4, %v36_v12, 0.0  ;;  %v52_v15 = vsel %vm51_vm5, %v36_v12, 0.0  ;;  %v47_v16 = vsel %vm46_vm6, %v36_v12, 0.0 }
  0x11   :  { %v58_v17 = vsel %vm37_vm0, %v57_v14, 0.0  ;;  %v53_v18 = vsel %vm37_vm0, %v52_v15, 0.0  ;;  %v48_v19 = vsel %vm37_vm0, %v47_v16, 0.0 }
  0x12   :  { %59 = vadd.xlane.f32.xlu1 %v58_v17  ;;  %54 = vadd.xlane.f32.xlu0 %v53_v18 }
  0x16   :  { %49 = vadd.xlane.f32.xlu1 %v48_v19 }
  0x8e   :  { %v40_v20 = vpop.xlane.xlu0 %39 }
  0x8f   :  { %v42_v21 = vmul.f32 0.33333334, %v40_v20 }
  0x91   :  { %v43_v22 = vmax.f32 %v42_v21, 1.0 }
  0x93   :  { %121 = vrcp.f32 %v43_v22 }
  0x9b   :  { %v60_v23 = vpop.xlane.xlu1 %59  ;;  %v55_v24 = vpop.xlane.xlu0 %54 }
  0x9c   :  { %v61_v26 = vsel %vm51_vm5, %v55_v24, %v60_v23 }
  0x9f   :  { %v50_v27 = vpop.xlane.xlu1 %49 }
  0xa0   :  { %v122_v25 = vpop.eup %121  ;;  %v62_v28 = vsel %vm46_vm6, %v50_v27, %v61_v26 }
  0xa1   :  { %v63_v29 = vmul.f32 %v122_v25, %v62_v28 }
  0xa3   :  { %v64_v30 = vsub.f32 %v14_v9, %v63_v29 }
  0xa5   :  { %v65_v31 = vmul.f32 %v64_v30, %v16_v2 }
  0xa7   :  { %v66_v32 = vmul.f32 %v65_v31, %v65_v31 }
  0xa9   :  { %71 = vrot.lane.b32.xlu1 %v66_v32, %s127_s1  ;;  %68 = vrot.lane.b32.xlu0 %v66_v32, %s128_s2 }
  0xad   :  { %77 = vrot.lane.b32.xlu1 %v66_v32, %s129_s16 }
  0xb1   :  { %80 = vrot.lane.b32.xlu1 %v66_v32, %s130_s17 }
 0x11b   :  { %v72_v33 = vpop.permute.xlu1 %71  ;;  %v69_v34 = vpop.permute.xlu0 %68 }
 0x11c   :  { %v75_v36 = vsel %vm74_vm7, %v69_v34, %v72_v33 }
 0x11d   :  { %v76_v37 = vadd.f32 %v75_v36, %v66_v32 }
 0x11f   :  { %v78_v35 = vpop.permute.xlu1 %77 }
 0x123   :  { %v81_v38 = vpop.permute.xlu1 %80 }
 0x124   :  { %v84_v39 = vsel %vm83_vm8, %v78_v35, %v81_v38 }
 0x125   :  { %v85_v40 = vadd.f32 %v84_v39, %v76_v37 }
 0x127   :  { %123 = vrsqrt.f32 %v85_v40  ;;  %vm88_vm9 = vcmp.eq.f32.partialorder %v85_v40, inf  ;;  %v91_v43 = vand.u32 2147483648, %v85_v40  ;;  %vm90_vm10 = vcmp.eq.f32.partialorder %v85_v40, 0.0 }
 0x134   :  { %v124_v41 = vpop.eup %123 }
 0x135   :  { %v87_v42 = vmul.f32 %v124_v41, %v85_v40 }
 0x137   :  { %v89_v44 = vsel %vm88_vm9, %v85_v40, %v87_v42 }
 0x138   :  { %v92_v45 = vsel %vm90_vm10, %v91_v43, %v89_v44 }
 0x139   :  { %v93_v46 = vsel %vm51_vm5, %v92_v45, 0.0 }
 0x13a   :  { %v94_v47 = vsel %vm37_vm0, %v93_v46, 0.0 }
 0x13b   :  { %95 = vadd.xlane.f32.xlu0 %v94_v47 }
 0x1c4   :  { %v96_v49 = vpop.xlane.xlu0 %95 }
 0x1c5   :  { %v97_v50 = vmul.f32 %v122_v25, %v96_v49 }
 0x1c7   :  { %v98_v51 = vadd.f32 1e-06, %v97_v50 }
 0x1c9   :  { %125 = vrcp.f32 %v98_v51 }
 0x1d6   :  { %v126_v53 = vpop.eup %125 }
 0x1d7   :  { %v100_v54 = vmul.f32 %v126_v53, %v17_v52 }
 0x1d9   :  { %103 = vperm.xlu1 %119, %v100_v54  }
 0x254   :  { %v104_v55 = vpop.permute.xlu1 %103 }
 0x255   :  { %v106_v56 = vmul.f32 %v104_v55, %v65_v31 }
 0x257   :  { %107 = vst.msk [vmem:[%s182_s3] sm:$0xff] %vm37_vm0, %v106_v56 }

</bundles_post_ra>
